<compile_context>
chip_gen: v7x
topology: tpu7x:2x2x1
jax: 0.10.0
libtpu: 0.0.40
codegen_flags: <defaults>
</compile_context>

<pallas_src>
import jax
import jax.numpy as jnp
from jax.experimental import pallas as pl
from jax.experimental.pallas import tpu as pltpu


def _round_up(a, b):
    return (a + b - 1) // b * b


def _conv_bn_act_kernel(x0_ref, x1_ref, x2_ref, w_ref, b_ref, o_ref):
    """One grid step = TM output image rows.

    x{0,1,2}_ref : (TM, Wp, C_in)   kh-shifted padded input rows (compute dtype)
    w_ref        : (9, C_in, Cp)    per-(kh,kw) weight matrices, Cp = padded C_out
    b_ref        : (1, Cp)          float32 bias (padded)
    o_ref        : (TM, Wo, Cp)     output rows (lane-dense: Cp = 128-multiple)
    """
    tm = x0_ref.shape[0]
    wo = o_ref.shape[1]
    cp = o_ref.shape[2]
    x_refs = (x0_ref, x1_ref, x2_ref)

    # Weights / bias are tiny and VMEM-resident across all grid steps
    # (constant index maps): load once per step, keep in vregs.
    w = [w_ref[k] for k in range(9)]
    bias = b_ref[...]                                    # (1, Cp) f32

    def row_body(r, carry):
        acc = jnp.zeros((wo, cp), jnp.float32)
        # In-kernel im2col: 3x3 window = 9 shifted (Wo, C_in) slabs, each
        # contracted against a (C_in, Cp) weight matrix on the MXU.
        for kh in range(3):
            for kw in range(3):
                xs = x_refs[kh][r, kw:kw + wo, :]        # (Wo, C_in)
                acc = acc + jnp.dot(xs, w[kh * 3 + kw],
                                    preferred_element_type=jnp.float32)
        # bias + ReLU (BatchNorm / Dropout are Identity in the default config).
        o_ref[r] = jnp.maximum(acc + bias, 0.0).astype(o_ref.dtype)
        return carry

    jax.lax.fori_loop(0, tm, row_body, 0)


def conv_bn_act(x, weight, bias, padding=0, *, compute_dtype=jnp.bfloat16,
                block_rows=None, vmem_budget_bytes=20 * 1024 * 1024):
    """relu(conv2d_3x3(x) + bias) for NCHW x, OIHW weight (PyTorch layout)."""
    N, C, H, W = x.shape
    C_out = weight.shape[0]
    Hp, Wp = H + 2 * padding, W + 2 * padding
    Ho, Wo = Hp - 2, Wp - 2
    Cp = _round_up(C_out, 128)                  # lane-dense output channels
    out_dtype = x.dtype

    # ---- glue (O(input) only): NHWC + spatial pad + compute-dtype cast.
    xp = jnp.transpose(x, (0, 2, 3, 1))
    xp = jnp.pad(xp, ((0, 0), (padding, padding), (padding, padding), (0, 0)))
    xp = xp.astype(compute_dtype)

    # ---- choose the row tile TM from an explicit VMEM budget.
    # Per image row (lane padding C_in -> 128 included):
    #   3 shifted inputs x 2 (double buffer) + 1 output x 2 (double buffer).
    M = N * Ho
    in_itemsize = jnp.dtype(compute_dtype).itemsize
    out_itemsize = jnp.dtype(out_dtype).itemsize
    bytes_per_row = (3 * 2 * _round_up(Wp, 8) * 128 * in_itemsize
                     + 2 * _round_up(Wo, 8) * Cp * out_itemsize)
    if block_rows is None:
        tm = (vmem_budget_bytes // bytes_per_row) // 8 * 8
        tm = max(8, min(tm, 512))
    else:
        tm = max(8, _round_up(block_rows, 8))
    tm = min(tm, _round_up(M, 8))
    M_pad = _round_up(M, tm)

    # ---- three kh-shifted row views (instead of a 9x im2col patch matrix).
    def shifted(kh):
        v = xp[:, kh:kh + Ho].reshape(N * Ho, Wp, C)
        return jnp.pad(v, ((0, M_pad - M), (0, 0), (0, 0)))
    x0, x1, x2 = shifted(0), shifted(1), shifted(2)

    # ---- weights: (C_out, C_in, 3, 3) -> (9, C_in, Cp), lane-dense in C_out.
    w_mat = jnp.transpose(weight, (2, 3, 1, 0)).reshape(9, C, C_out)
    w_mat = jnp.pad(w_mat.astype(compute_dtype),
                    ((0, 0), (0, 0), (0, Cp - C_out)))
    b_mat = jnp.pad(bias.astype(jnp.float32), (0, Cp - C_out)).reshape(1, Cp)

    grid = (M_pad // tm,)
    row_spec = pl.BlockSpec((tm, Wp, C), lambda i: (i, 0, 0))

    out = pl.pallas_call(
        _conv_bn_act_kernel,
        out_shape=jax.ShapeDtypeStruct((M_pad, Wo, Cp), out_dtype),
        grid=grid,
        in_specs=[
            row_spec, row_spec, row_spec,                     # kh = 0, 1, 2
            pl.BlockSpec((9, C, Cp), lambda i: (0, 0, 0)),    # weights: resident
            pl.BlockSpec((1, Cp), lambda i: (0, 0)),          # bias: resident
        ],
        out_specs=pl.BlockSpec((tm, Wo, Cp), lambda i: (i, 0, 0)),
        compiler_params=pltpu.CompilerParams(
            dimension_semantics=("parallel",),   # v7x: shard row tiles over 2 TCs
            vmem_limit_bytes=32 * 1024 * 1024),
    )(x0, x1, x2, w_mat, b_mat)

    # ---- back to NCHW, dropping row/channel padding (see TODO at top).
    out = out[:M, :, :C_out].reshape(N, Ho, Wo, C_out)
    return jnp.transpose(out, (0, 3, 1, 2))


def _reference(x, weight, bias, padding=0):
    y = jax.lax.conv_general_dilated(
        x, weight, window_strides=(1, 1),
        padding=[(padding, padding), (padding, padding)],
        dimension_numbers=("NCHW", "OIHW", "NCHW"))
    return jnp.maximum(y + bias[None, :, None, None], 0.0)


if __name__ == "__main__":
    key = jax.random.PRNGKey(0)
    kx, kw, kb = jax.random.split(key, 3)

    N, C_in, H, W = 2, 4, 16, 16
    C_out = 8
    padding = 0  # module default

    x = jax.random.normal(kx, (N, C_in, H, W), dtype=jnp.float32)

    # Deterministic PyTorch-style init: U(-1/sqrt(fan_in), 1/sqrt(fan_in)).
    fan_in = C_in * 3 * 3
    bound = 1.0 / (fan_in ** 0.5)
    weight = jax.random.uniform(kw, (C_out, C_in, 3, 3), jnp.float32,
                                minval=-bound, maxval=bound)
    bias = jax.random.uniform(kb, (C_out,), jnp.float32,
                              minval=-bound, maxval=bound)

    y_ref = _reference(x, weight, bias, padding=padding)

    # f32 path, tight tolerance; block_rows=8 forces a 4-step grid so the
    # row-tiling / index maps are actually exercised at this small size.
    y32 = conv_bn_act(x, weight, bias, padding=padding,
                      compute_dtype=jnp.float32, block_rows=8)
    y32 = jax.block_until_ready(y32)
    assert y32.shape == (N, C_out, H - 2, W - 2), y32.shape
    assert jnp.allclose(y32, y_ref, atol=5e-4, rtol=5e-4), "f32 mismatch"

    # Default bf16 compute path (v6e/v7x MXU-native), relaxed tolerance.
    ybf = jax.block_until_ready(conv_bn_act(x, weight, bias, padding=padding))
    assert ybf.shape == (N, C_out, H - 2, W - 2), ybf.shape
    assert jnp.allclose(ybf, y_ref, atol=5e-2, rtol=5e-2), "bf16 mismatch"

    print("KERNEL_OK")
</pallas_src>

<mosaic_0001>
module attributes {stable_mosaic.version = 11 : i64} {
  func.func @_conv_bn_act_kernel(%arg0: i32, %arg1: memref<8x16x4xf32, #tpu.memory_space<vmem>>, %arg2: memref<8x16x4xf32, #tpu.memory_space<vmem>>, %arg3: memref<8x16x4xf32, #tpu.memory_space<vmem>>, %arg4: memref<9x4x128xf32, #tpu.memory_space<vmem>>, %arg5: memref<1x128xf32, #tpu.memory_space<vmem>>, %arg6: memref<8x14x128xf32, #tpu.memory_space<vmem>>) attributes {dimension_semantics = [#tpu.dimension_semantics<parallel>], iteration_bounds = array<i64: 4>, scalar_prefetch = 0 : i64, scratch_operands = 0 : i64, tpu.core_type = #tpu.core_type<tc>, window_params = [{transform_indices = @transform_0, window_bounds = array<i64: 8, 16, 4>}, {transform_indices = @transform_1, window_bounds = array<i64: 8, 16, 4>}, {transform_indices = @transform_2, window_bounds = array<i64: 8, 16, 4>}, {pipeline_mode = #tpu.pipeline_mode<synchronous>, transform_indices = @transform_3, window_bounds = array<i64: 9, 4, 128>}, {pipeline_mode = #tpu.pipeline_mode<synchronous>, transform_indices = @transform_4, window_bounds = array<i64: 1, 128>}, {transform_indices = @transform_5, window_bounds = array<i64: 8, 14, 128>}]} {
    %c0 = arith.constant 0 : index
    %c0_0 = arith.constant 0 : index
    %c0_1 = arith.constant 0 : index
    %0 = vector.load %arg4[%c0, %c0_0, %c0_1] : memref<9x4x128xf32, #tpu.memory_space<vmem>>, vector<1x4x128xf32>
    %1 = vector.shape_cast %0 : vector<1x4x128xf32> to vector<4x128xf32>
    %c1 = arith.constant 1 : index
    %c0_2 = arith.constant 0 : index
    %c0_3 = arith.constant 0 : index
    %2 = vector.load %arg4[%c1, %c0_2, %c0_3] : memref<9x4x128xf32, #tpu.memory_space<vmem>>, vector<1x4x128xf32>
    %3 = vector.shape_cast %2 : vector<1x4x128xf32> to vector<4x128xf32>
    %c2 = arith.constant 2 : index
    %c0_4 = arith.constant 0 : index
    %c0_5 = arith.constant 0 : index
    %4 = vector.load %arg4[%c2, %c0_4, %c0_5] : memref<9x4x128xf32, #tpu.memory_space<vmem>>, vector<1x4x128xf32>
    %5 = vector.shape_cast %4 : vector<1x4x128xf32> to vector<4x128xf32>
    %c3 = arith.constant 3 : index
    %c0_6 = arith.constant 0 : index
    %c0_7 = arith.constant 0 : index
    %6 = vector.load %arg4[%c3, %c0_6, %c0_7] : memref<9x4x128xf32, #tpu.memory_space<vmem>>, vector<1x4x128xf32>
    %7 = vector.shape_cast %6 : vector<1x4x128xf32> to vector<4x128xf32>
    %c4 = arith.constant 4 : index
    %c0_8 = arith.constant 0 : index
    %c0_9 = arith.constant 0 : index
    %8 = vector.load %arg4[%c4, %c0_8, %c0_9] : memref<9x4x128xf32, #tpu.memory_space<vmem>>, vector<1x4x128xf32>
    %9 = vector.shape_cast %8 : vector<1x4x128xf32> to vector<4x128xf32>
    %c5 = arith.constant 5 : index
    %c0_10 = arith.constant 0 : index
    %c0_11 = arith.constant 0 : index
    %10 = vector.load %arg4[%c5, %c0_10, %c0_11] : memref<9x4x128xf32, #tpu.memory_space<vmem>>, vector<1x4x128xf32>
    %11 = vector.shape_cast %10 : vector<1x4x128xf32> to vector<4x128xf32>
    %c6 = arith.constant 6 : index
    %c0_12 = arith.constant 0 : index
    %c0_13 = arith.constant 0 : index
    %12 = vector.load %arg4[%c6, %c0_12, %c0_13] : memref<9x4x128xf32, #tpu.memory_space<vmem>>, vector<1x4x128xf32>
    %13 = vector.shape_cast %12 : vector<1x4x128xf32> to vector<4x128xf32>
    %c7 = arith.constant 7 : index
    %c0_14 = arith.constant 0 : index
    %c0_15 = arith.constant 0 : index
    %14 = vector.load %arg4[%c7, %c0_14, %c0_15] : memref<9x4x128xf32, #tpu.memory_space<vmem>>, vector<1x4x128xf32>
    %15 = vector.shape_cast %14 : vector<1x4x128xf32> to vector<4x128xf32>
    %c8 = arith.constant 8 : index
    %c0_16 = arith.constant 0 : index
    %c0_17 = arith.constant 0 : index
    %16 = vector.load %arg4[%c8, %c0_16, %c0_17] : memref<9x4x128xf32, #tpu.memory_space<vmem>>, vector<1x4x128xf32>
    %17 = vector.shape_cast %16 : vector<1x4x128xf32> to vector<4x128xf32>
    %c0_18 = arith.constant 0 : index
    %c0_19 = arith.constant 0 : index
    %18 = vector.load %arg5[%c0_18, %c0_19] : memref<1x128xf32, #tpu.memory_space<vmem>>, vector<1x128xf32>
    %c0_i32 = arith.constant 0 : i32
    %c8_i32 = arith.constant 8 : i32
    %19 = arith.addi %c0_i32, %c8_i32 : i32
    %c1_i32 = arith.constant 1 : i32
    scf.for %arg7 = %c0_i32 to %19 step %c1_i32  : i32 {
      %cst = arith.constant 0.000000e+00 : f32
      %20 = vector.broadcast %cst : f32 to vector<14x128xf32>
      %21 = arith.index_cast %arg7 : i32 to index
      %c0_21 = arith.constant 0 : index
      %c0_22 = arith.constant 0 : index
      %22 = vector.load %arg1[%21, %c0_21, %c0_22] : memref<8x16x4xf32, #tpu.memory_space<vmem>>, vector<1x14x4xf32>
      %23 = vector.shape_cast %22 : vector<1x14x4xf32> to vector<14x4xf32>
      %cst_23 = arith.constant dense<0.000000e+00> : vector<14x128xf32>
      %24 = tpu.matmul %23, %1, %cst_23 {dimension_numbers = #tpu.dot_dimension_numbers<[1], [0], [0], [1], [0, 0, 1, 1], [], []>} : vector<14x4xf32>, vector<4x128xf32>, vector<14x128xf32> -> vector<14x128xf32>
      %25 = arith.addf %20, %24 : vector<14x128xf32>
      %26 = arith.index_cast %arg7 : i32 to index
      %c1_24 = arith.constant 1 : index
      %c0_25 = arith.constant 0 : index
      %27 = vector.load %arg1[%26, %c1_24, %c0_25] : memref<8x16x4xf32, #tpu.memory_space<vmem>>, vector<1x14x4xf32>
      %28 = vector.shape_cast %27 : vector<1x14x4xf32> to vector<14x4xf32>
      %cst_26 = arith.constant dense<0.000000e+00> : vector<14x128xf32>
      %29 = tpu.matmul %28, %3, %cst_26 {dimension_numbers = #tpu.dot_dimension_numbers<[1], [0], [0], [1], [0, 0, 1, 1], [], []>} : vector<14x4xf32>, vector<4x128xf32>, vector<14x128xf32> -> vector<14x128xf32>
      %30 = arith.addf %25, %29 : vector<14x128xf32>
      %31 = arith.index_cast %arg7 : i32 to index
      %c2_27 = arith.constant 2 : index
      %c0_28 = arith.constant 0 : index
      %32 = vector.load %arg1[%31, %c2_27, %c0_28] : memref<8x16x4xf32, #tpu.memory_space<vmem>>, vector<1x14x4xf32>
      %33 = vector.shape_cast %32 : vector<1x14x4xf32> to vector<14x4xf32>
      %cst_29 = arith.constant dense<0.000000e+00> : vector<14x128xf32>
      %34 = tpu.matmul %33, %5, %cst_29 {dimension_numbers = #tpu.dot_dimension_numbers<[1], [0], [0], [1], [0, 0, 1, 1], [], []>} : vector<14x4xf32>, vector<4x128xf32>, vector<14x128xf32> -> vector<14x128xf32>
      %35 = arith.addf %30, %34 : vector<14x128xf32>
      %36 = arith.index_cast %arg7 : i32 to index
      %c0_30 = arith.constant 0 : index
      %c0_31 = arith.constant 0 : index
      %37 = vector.load %arg2[%36, %c0_30, %c0_31] : memref<8x16x4xf32, #tpu.memory_space<vmem>>, vector<1x14x4xf32>
      %38 = vector.shape_cast %37 : vector<1x14x4xf32> to vector<14x4xf32>
      %cst_32 = arith.constant dense<0.000000e+00> : vector<14x128xf32>
      %39 = tpu.matmul %38, %7, %cst_32 {dimension_numbers = #tpu.dot_dimension_numbers<[1], [0], [0], [1], [0, 0, 1, 1], [], []>} : vector<14x4xf32>, vector<4x128xf32>, vector<14x128xf32> -> vector<14x128xf32>
      %40 = arith.addf %35, %39 : vector<14x128xf32>
      %41 = arith.index_cast %arg7 : i32 to index
      %c1_33 = arith.constant 1 : index
      %c0_34 = arith.constant 0 : index
      %42 = vector.load %arg2[%41, %c1_33, %c0_34] : memref<8x16x4xf32, #tpu.memory_space<vmem>>, vector<1x14x4xf32>
      %43 = vector.shape_cast %42 : vector<1x14x4xf32> to vector<14x4xf32>
      %cst_35 = arith.constant dense<0.000000e+00> : vector<14x128xf32>
      %44 = tpu.matmul %43, %9, %cst_35 {dimension_numbers = #tpu.dot_dimension_numbers<[1], [0], [0], [1], [0, 0, 1, 1], [], []>} : vector<14x4xf32>, vector<4x128xf32>, vector<14x128xf32> -> vector<14x128xf32>
      %45 = arith.addf %40, %44 : vector<14x128xf32>
      %46 = arith.index_cast %arg7 : i32 to index
      %c2_36 = arith.constant 2 : index
      %c0_37 = arith.constant 0 : index
      %47 = vector.load %arg2[%46, %c2_36, %c0_37] : memref<8x16x4xf32, #tpu.memory_space<vmem>>, vector<1x14x4xf32>
      %48 = vector.shape_cast %47 : vector<1x14x4xf32> to vector<14x4xf32>
      %cst_38 = arith.constant dense<0.000000e+00> : vector<14x128xf32>
      %49 = tpu.matmul %48, %11, %cst_38 {dimension_numbers = #tpu.dot_dimension_numbers<[1], [0], [0], [1], [0, 0, 1, 1], [], []>} : vector<14x4xf32>, vector<4x128xf32>, vector<14x128xf32> -> vector<14x128xf32>
      %50 = arith.addf %45, %49 : vector<14x128xf32>
      %51 = arith.index_cast %arg7 : i32 to index
      %c0_39 = arith.constant 0 : index
      %c0_40 = arith.constant 0 : index
      %52 = vector.load %arg3[%51, %c0_39, %c0_40] : memref<8x16x4xf32, #tpu.memory_space<vmem>>, vector<1x14x4xf32>
      %53 = vector.shape_cast %52 : vector<1x14x4xf32> to vector<14x4xf32>
      %cst_41 = arith.constant dense<0.000000e+00> : vector<14x128xf32>
      %54 = tpu.matmul %53, %13, %cst_41 {dimension_numbers = #tpu.dot_dimension_numbers<[1], [0], [0], [1], [0, 0, 1, 1], [], []>} : vector<14x4xf32>, vector<4x128xf32>, vector<14x128xf32> -> vector<14x128xf32>
      %55 = arith.addf %50, %54 : vector<14x128xf32>
      %56 = arith.index_cast %arg7 : i32 to index
      %c1_42 = arith.constant 1 : index
      %c0_43 = arith.constant 0 : index
      %57 = vector.load %arg3[%56, %c1_42, %c0_43] : memref<8x16x4xf32, #tpu.memory_space<vmem>>, vector<1x14x4xf32>
      %58 = vector.shape_cast %57 : vector<1x14x4xf32> to vector<14x4xf32>
      %cst_44 = arith.constant dense<0.000000e+00> : vector<14x128xf32>
      %59 = tpu.matmul %58, %15, %cst_44 {dimension_numbers = #tpu.dot_dimension_numbers<[1], [0], [0], [1], [0, 0, 1, 1], [], []>} : vector<14x4xf32>, vector<4x128xf32>, vector<14x128xf32> -> vector<14x128xf32>
      %60 = arith.addf %55, %59 : vector<14x128xf32>
      %61 = arith.index_cast %arg7 : i32 to index
      %c2_45 = arith.constant 2 : index
      %c0_46 = arith.constant 0 : index
      %62 = vector.load %arg3[%61, %c2_45, %c0_46] : memref<8x16x4xf32, #tpu.memory_space<vmem>>, vector<1x14x4xf32>
      %63 = vector.shape_cast %62 : vector<1x14x4xf32> to vector<14x4xf32>
      %cst_47 = arith.constant dense<0.000000e+00> : vector<14x128xf32>
      %64 = tpu.matmul %63, %17, %cst_47 {dimension_numbers = #tpu.dot_dimension_numbers<[1], [0], [0], [1], [0, 0, 1, 1], [], []>} : vector<14x4xf32>, vector<4x128xf32>, vector<14x128xf32> -> vector<14x128xf32>
      %65 = arith.addf %60, %64 : vector<14x128xf32>
      %66 = vector.broadcast %18 : vector<1x128xf32> to vector<14x128xf32>
      %67 = arith.addf %65, %66 : vector<14x128xf32>
      %cst_48 = arith.constant 0.000000e+00 : f32
      %68 = vector.broadcast %cst_48 : f32 to vector<14x128xf32>
      %69 = arith.maximumf %67, %68 : vector<14x128xf32>
      %70 = arith.index_cast %arg7 : i32 to index
      %c0_49 = arith.constant 0 : index
      %c0_50 = arith.constant 0 : index
      %71 = vector.load %arg6[%70, %c0_49, %c0_50] : memref<8x14x128xf32, #tpu.memory_space<vmem>>, vector<1x14x128xf32>
      %72 = vector.shape_cast %71 : vector<1x14x128xf32> to vector<14x128xf32>
      %73 = vector.shape_cast %69 : vector<14x128xf32> to vector<1x14x128xf32>
      tpu.vector_store %arg6[%70, %c0_49, %c0_50], %73 {strides = array<i32>} : memref<8x14x128xf32, #tpu.memory_space<vmem>>, vector<1x14x128xf32>,
    }
    %c8_i32_20 = arith.constant 8 : i32
    return
  }
  func.func @transform_0(%arg0: i32) -> (i32, i32, i32) {
    %c0_i32 = arith.constant 0 : i32
    %c0_i32_0 = arith.constant 0 : i32
    %c0_i32_1 = arith.constant 0 : i32
    return %arg0, %c0_i32, %c0_i32_0 : i32, i32, i32
  }
  func.func @transform_1(%arg0: i32) -> (i32, i32, i32) {
    %c0_i32 = arith.constant 0 : i32
    %c0_i32_0 = arith.constant 0 : i32
    %c0_i32_1 = arith.constant 0 : i32
    return %arg0, %c0_i32, %c0_i32_0 : i32, i32, i32
  }
  func.func @transform_2(%arg0: i32) -> (i32, i32, i32) {
    %c0_i32 = arith.constant 0 : i32
    %c0_i32_0 = arith.constant 0 : i32
    %c0_i32_1 = arith.constant 0 : i32
    return %arg0, %c0_i32, %c0_i32_0 : i32, i32, i32
  }
  func.func @transform_3(%arg0: i32) -> (i32, i32, i32) {
    %c0_i32 = arith.constant 0 : i32
    %c0_i32_0 = arith.constant 0 : i32
    %c0_i32_1 = arith.constant 0 : i32
    %c0_i32_2 = arith.constant 0 : i32
    return %c0_i32, %c0_i32_0, %c0_i32_1 : i32, i32, i32
  }
  func.func @transform_4(%arg0: i32) -> (i32, i32) {
    %c0_i32 = arith.constant 0 : i32
    %c0_i32_0 = arith.constant 0 : i32
    %c0_i32_1 = arith.constant 0 : i32
    return %c0_i32, %c0_i32_0 : i32, i32
  }
  func.func @transform_5(%arg0: i32) -> (i32, i32, i32) {
    %c0_i32 = arith.constant 0 : i32
    %c0_i32_0 = arith.constant 0 : i32
    %c0_i32_1 = arith.constant 0 : i32
    return %arg0, %c0_i32, %c0_i32_0 : i32, i32, i32
  }
}

</mosaic_0001>

<bundles_post_ra>
// kernel: tpu_custom_call.1
= control target key start
LH: loop header
LB: loop body
LE: loop exit
PB: predicated region body
PF: predicated region fallthrough
CT: control target
= control target key end

     0   :  { %s1419_s18 = smov 0   ;;  %s1613_s0 = inlined_call_operand.vmem [shape: f32[32,16,4], index: 0, kind: input, shape index: {}]   ;;  %s1614_s1 = inlined_call_operand.vmem [shape: f32[32,16,4], index: 1, kind: input, shape index: {}]   ;;  %s1615_s2 = inlined_call_operand.vmem [shape: f32[32,16,4], index: 2, kind: input, shape index: {}]   ;;  %s1616_s3 = inlined_call_operand.vmem [shape: f32[9,4,128], index: 3, kind: input, shape index: {}]   ;;  %s1617_s4 = inlined_call_operand.vmem [shape: f32[1,128], index: 4, kind: input, shape index: {}]   ;;  %s1618_s5 = inlined_call_operand.vmem [shape: f32[32,14,128], index: 5, kind: output, shape index: {}]  }
   0x1 LB: > { %s1209_s19 = sadd.s32 4294967295, %s1383_s18   ;;  %p1213_p0 = scmp.ge.s32.totalorder %s1383_s18, 1  ;;  %s1383_s18 = sphi %s1419_s18, %s15_s18  }
   0x2   : > { %p213_p1 = scmp.lt.s32.totalorder %s1383_s18, 5 }
   0x4   : > { %p214_p2 = pnand %p1213_p0, %p213_p1 }
   0x5   : > { %s1214_s20 = sshll.u32 (!%p214_p2), %s1209_s19, 3  ;;  %v1430_v0 = vld [vmem:[%s1616_s3] sm:$0xf] (!%p214_p2)  ;;  %v1435_v1 = vld [vmem:[%s1616_s3 + $0x4] sm:$0xf] (!%p214_p2)  ;;  %s1495_s30 = smov (!%p214_p2), 0  }
   0x6   : > { %217 = sbr.rel (%p214_p2) target bundleno = 274 (0x112), region = 40  ;;  %p256_p3 = scmp.lt.s32.totalorder (!%p214_p2), %s1214_s20, 31  ;;  %v1440_v2 = vld [vmem:[%s1616_s3 + $0x8] sm:$0xf] (!%p214_p2)  ;;  %v1445_v3 = vld [vmem:[%s1616_s3 + $0xc] sm:$0xf] (!%p214_p2) }
   0x7   : > { %v1450_v4 = vld [vmem:[%s1616_s3 + $0x10] sm:$0xf] (!%p214_p2)  ;;  %v1455_v5 = vld [vmem:[%s1616_s3 + $0x14] sm:$0xf] (!%p214_p2)  ;;  %v1460_v6 = vld [vmem:[%s1616_s3 + $0x18] sm:$0xf] (!%p214_p2) }
   0x8   : > { %v1465_v7 = vld [vmem:[%s1616_s3 + $0x1c] sm:$0xf] (!%p214_p2)  ;;  %v1470_v8 = vld [vmem:[%s1616_s3 + $0x20] sm:$0xf] (!%p214_p2) }
   0x9   : > { %v1475_v9 = vld [vmem:[%s1617_s4] ss:$0 sm:$0xff] (!%p214_p2) }
   0xd   : > { %s1620_s20 = smov (!%p256_p3, %s1214_s20), 31 }
   0xe   : > { %s1477_s16 = sshll.u32 %s1620_s20, 4 }
   0xf   : > { %s260_s21 = scalar_lea.vmem %s1613_s0, %s1477_s16  ;;  %s267_s24 = scalar_lea.vmem %s1614_s1, %s1477_s16 }
  0x10   : > { %s274_s27 = scalar_lea.vmem %s1615_s2, %s1477_s16  ;;  %s281_s20 = scalar_lea.vmem %s1618_s5, %s1477_s16 }
  0x11 LB: >> { %vm320_vm0 = vcmask 1043456   ;;  %s1509_s6 = sshll.u32 %s1387_s30, 4  ;;  %vm313_vm1 = vcmask 31744   ;;  %s306_s30 = sadd.s32 1, %s1387_s30   ;;  %s1387_s30 = sphi %s1495_s30, %s306_s30  }
  0x12   : >> { %1316 = vmatprep.subr.msk.mxu0 %vm320_vm0, %v1450_v4  ;;  %1296 = vmatprep.subr.msk.mxu1 %vm320_vm0, %v1435_v1  ;;  %s1517_s9 = scalar_lea.vmem %s260_s21, %s1509_s6  ;;  %s1525_s12 = scalar_lea.vmem %s267_s24, %s1509_s6 }
  0x13   : >> { %1317 = vmatpush3.msk.msra.mxu0 %vm320_vm0, %v1450_v4  ;;  %1297 = vmatpush3.msk.msra.mxu1 %vm320_vm0, %v1435_v1  ;;  %v311_v10 = vld [vmem:[%s1517_s9 + $0x1] sm:$0xff]  ;;  %v312_v12 = vld [vmem:[%s1517_s9 + $0x9] sm:$0x3f]  ;;  %s1557_s15 = scalar_lea.vmem %s274_s27, %s1509_s6  ;;  %s1111_s22 = scalar_lea.vmem %s281_s20, %s1509_s6 }
  0x14   : >> { %1321 = vmatprep.subr.msk.mxu0 %vm320_vm0, %v1455_v5  ;;  %1301 = vmatprep.subr.msk.mxu1 %vm320_vm0, %v1430_v0  ;;  %v660_v11 = vld [vmem:[%s1525_s12 + $0x1] sm:$0xff]  ;;  %v661_v13 = vld [vmem:[%s1525_s12 + $0x9] sm:$0x3f]  ;;  %p303_p4 = scmp.ge.s32.totalorder %s306_s30, 8  }
  0x15   : >> { %1298 = vmatprep.mubr.msk.f32.mxu1 %vm313_vm1, %v311_v10  ;;  %1318 = vmatprep.mubr.msk.f32.mxu0 %vm313_vm1, %v660_v11  ;;  %v309_v14 = vld [vmem:[%s1517_s9] sm:$0xff]  ;;  %v310_v16 = vld [vmem:[%s1517_s9 + $0x8] sm:$0x3f] }
  0x16   : >> { %v748_v15 = vld [vmem:[%s1525_s12 + $0x2] sm:$0xff]  ;;  %1299 = vmatmul.mubr.msk.f32.vlgmr.msra.gmra.mrb[0].mxu1 %vm313_vm1, %v312_v12  ;;  %1319 = vmatmul.mubr.msk.f32.vlgmr.msra.gmra.mrb[0].mxu0 %vm313_vm1, %v661_v13  ;;  %v749_v17 = vld [vmem:[%s1525_s12 + $0xa] sm:$0x3f] }
  0x17   : >> { %1322 = vmatpush3.msk.msra.mxu0 %vm320_vm0, %v1455_v5  ;;  %1302 = vmatpush3.msk.msra.mxu1 %vm320_vm0, %v1430_v0  ;;  %v483_v18 = vld [vmem:[%s1517_s9 + $0x2] sm:$0xff]  ;;  %v484_v20 = vld [vmem:[%s1517_s9 + $0xa] sm:$0x3f] }
  0x18   : >> { %1303 = vmatprep.mubr.msk.f32.mxu1 %vm313_vm1, %v309_v14  ;;  %1323 = vmatprep.mubr.msk.f32.mxu0 %vm313_vm1, %v748_v15  ;;  %v837_v19 = vld [vmem:[%s1557_s15] sm:$0xff]  ;;  %v838_v21 = vld [vmem:[%s1557_s15 + $0x8] sm:$0x3f] }
  0x19   : >> { %1326 = vmatprep.subr.msk.mxu0 %vm320_vm0, %v1460_v6  ;;  %1306 = vmatprep.subr.msk.mxu1 %vm320_vm0, %v1440_v2  ;;  %v572_v22 = vld [vmem:[%s1525_s12] sm:$0xff]  ;;  %v573_v24 = vld [vmem:[%s1525_s12 + $0x8] sm:$0x3f] }
  0x1a   : >> { %v925_v23 = vld [vmem:[%s1557_s15 + $0x1] sm:$0xff]  ;;  %v926_v25 = vld [vmem:[%s1557_s15 + $0x9] sm:$0x3f] }
  0x1b   : >> { %v1013_v26 = vld [vmem:[%s1557_s15 + $0x2] sm:$0xff]  ;;  %v1014_v27 = vld [vmem:[%s1557_s15 + $0xa] sm:$0x3f] }
  0x1e   : >> { %1304 = vmatmul.mubr.msk.f32.vlgmr.msra.gmra.mrb[0].mxu1 %vm313_vm1, %v310_v16  ;;  %1324 = vmatmul.mubr.msk.f32.vlgmr.msra.gmra.mrb[0].mxu0 %vm313_vm1, %v749_v17 }
  0x1f   : >> { %1327 = vmatpush3.msk.msra.mxu0 %vm320_vm0, %v1460_v6  ;;  %1307 = vmatpush3.msk.msra.mxu1 %vm320_vm0, %v1440_v2 }
  0x20   : >> { %1308 = vmatprep.mubr.msk.f32.mxu1 %vm313_vm1, %v483_v18  ;;  %1328 = vmatprep.mubr.msk.f32.mxu0 %vm313_vm1, %v837_v19 }
  0x21   : >> { %1331 = vmatprep.subr.msk.mxu0 %vm320_vm0, %v1465_v7  ;;  %1311 = vmatprep.subr.msk.mxu1 %vm320_vm0, %v1445_v3 }
  0x26   : >> { %1309 = vmatmul.mubr.msk.f32.vlgmr.msra.gmra.mrb[0].mxu1 %vm313_vm1, %v484_v20  ;;  %1329 = vmatmul.mubr.msk.f32.vlgmr.msra.gmra.mrb[0].mxu0 %vm313_vm1, %v838_v21 }
  0x27   : >> { %1332 = vmatpush3.msk.msra.mxu0 %vm320_vm0, %v1465_v7  ;;  %1312 = vmatpush3.msk.msra.mxu1 %vm320_vm0, %v1445_v3 }
  0x28   : >> { %1313 = vmatprep.mubr.msk.f32.mxu1 %vm313_vm1, %v572_v22  ;;  %1333 = vmatprep.mubr.msk.f32.mxu0 %vm313_vm1, %v925_v23 }
  0x29   : >> { %1336 = vmatprep.subr.msk.mxu0 %vm320_vm0, %v1470_v8 }
  0x2e   : >> { %1314 = vmatmul.mubr.msk.f32.vlgmr.msra.gmra.mrb[0].mxu1 %vm313_vm1, %v573_v24  ;;  %1334 = vmatmul.mubr.msk.f32.vlgmr.msra.gmra.mrb[0].mxu0 %vm313_vm1, %v926_v25 }
  0x2f   : >> { %1337 = vmatpush3.msk.msra.mxu0 %vm320_vm0, %v1470_v8  ;;  %1338 = vmatprep.mubr.msk.f32.mxu0 %vm313_vm1, %v1013_v26 }
  0x36   : >> { %1339 = vmatmul.mubr.msk.f32.vlgmr.msra.gmra.mrb[0].mxu0 %vm313_vm1, %v1014_v27 }
 0x101   : >> { %v1315_v28 = vpop.f32.mrb[0].mxu1 }
 0x102   : >> { %v649_v29 = vpop.f32.mrb[1].mxu1 }
 0x109   : >> { %v1340_v30 = vpop.f32.mrb[0].mxu0 }
 0x10a   : >> { %v1341_v31 = vadd.f32 %v1340_v30, %v1315_v28  ;;  %v1090_v32 = vpop.f32.mrb[1].mxu0 }
 0x10b   : >> { %v1342_v33 = vadd.f32 %v1090_v32, %v649_v29  ;;  %305 = sbr.rel (!%p303_p4) target bundleno = 17 (0x11), region = 95 }
 0x10c   : >> { %v1108_v34 = vadd.f32 %v1341_v31, %v1475_v9 }
 0x10d   : >> { %v1107_v35 = vadd.f32 %v1342_v33, %v1475_v9 }
 0x10e   : >> { %v1110_v36 = vmax.f32 %v1108_v34, 0.0 }
 0x10f   : >> { %v1109_v37 = vmax.f32 %v1107_v35, 0.0 }
 0x110   : >> { %1113 = vst [vmem:[%s1111_s22 + $0x8] sm:$0x3f] %v1110_v36 }
 0x111   : >> { %1112 = vst [vmem:[%s1111_s22] sm:$0xff] %v1109_v37 }
 0x112 PF: > { %s15_s18 = sadd.s32 1, %s1383_s18  }
 0x113   : > { %p12_p5 = scmp.ge.s32.totalorder %s15_s18, 6  }
 0x115   :  { %14 = sbr.rel (!%p12_p5) target bundleno = 1 (0x1), region = 106 }

</bundles_post_ra>
